<compile_context>
chip_gen: v7x
topology: tpu7x:2x2x1
jax: 0.10.0
libtpu: 0.0.40
codegen_flags: <defaults>
</compile_context>

<pallas_src>
import jax
import jax.numpy as jnp
from jax.experimental import pallas as pl
from jax.experimental.pallas import tpu as pltpu


def _masker_kernel(p_ref, u_ref, mask_ref, logit1_ref):
    # p_ref: (2, H, tile_n) packed logits; u_ref: (H, tile_n) uniform noise.
    l0 = p_ref[0].astype(jnp.float32)
    l1 = p_ref[1].astype(jnp.float32)

    # mask_logits[..., 1] = log_softmax([l0, l1])[..., 1] = -softplus(l0 - l1)
    d = l0 - l1
    ml1 = -(jnp.maximum(d, 0.0) + jnp.log1p(jnp.exp(-jnp.abs(d))))
    logit1_ref[...] = ml1.astype(logit1_ref.dtype)

    # Hard gumbel-softmax argmax on raw logits (the LSE term cancels):
    #   class 1 wins  <=>  l1 + g1 > l0 + g0  <=>  (l1 - l0) + logistic > 0
    # with logistic = g1 - g0 = log(u) - log1p(-u), u ~ U(0, 1).
    u = jnp.clip(u_ref[...], 1e-7, 1.0 - 1e-7)
    logistic = jnp.log(u) - jnp.log1p(-u)
    mask_ref[...] = ((l1 - l0) + logistic > 0.0).astype(mask_ref.dtype)
    # TODO(synk): only the forward value of hard gumbel-softmax is reproduced;
    # the straight-through (soft) backward is a training-time detail.


def _pick_node_tile(n_nodes: int) -> int:
    """Largest lane-aligned tile width that divides n_nodes (else one block)."""
    for cand in (2048, 1024, 512, 256, 128):
        if n_nodes % cand == 0:
            return cand
    return n_nodes


def masker_forward(params_2hn, key, *, mask_dtype=jnp.float32):
    """params_2hn: (2, H, N) float32 -- plane 0 = class-0 logits, plane 1 = class-1.
    key: jax PRNG key for the gumbel(-argmax) noise.
    Returns (mask, mask_logits_1), both (H, N); mask values are exactly 0/1."""
    two, H, N = params_2hn.shape
    assert two == 2, "expected packed (2, n_heads, n_nodes) parameter"

    # One uniform draw per element; difference of two Gumbels is one logistic.
    u = jax.random.uniform(key, (H, N), dtype=jnp.float32)

    tn = _pick_node_tile(N)
    grid = (N // tn,)

    mask, logit1 = pl.pallas_call(
        _masker_kernel,
        out_shape=(
            jax.ShapeDtypeStruct((H, N), mask_dtype),
            jax.ShapeDtypeStruct((H, N), jnp.float32),
        ),
        grid=grid,
        in_specs=[
            pl.BlockSpec((2, H, tn), lambda j: (0, 0, j)),   # packed logits
            pl.BlockSpec((H, tn), lambda j: (0, j)),          # uniform noise
        ],
        out_specs=(
            pl.BlockSpec((H, tn), lambda j: (0, j)),
            pl.BlockSpec((H, tn), lambda j: (0, j)),
        ),
        compiler_params=pltpu.CompilerParams(
            dimension_semantics=("parallel",),   # shard node tiles across TCs
        ),
    )(params_2hn, u)
    return mask, logit1


def init_masker_params(key, n_heads, n_nodes):
    """xavier_normal_ on an (H, N, 2) tensor, stored packed as (2, H, N)."""
    fan_in = n_nodes * 2     # dims[1] * receptive_field(=2)
    fan_out = n_heads * 2    # dims[0] * receptive_field(=2)
    std = (2.0 / (fan_in + fan_out)) ** 0.5
    p = jax.random.normal(key, (n_heads, n_nodes, 2), dtype=jnp.float32) * std
    return jnp.moveaxis(p, -1, 0)   # one-time repack at init: (2, H, N)


if __name__ == "__main__":
    n_heads, n_nodes = 8, 384            # 384 = 3 * 128 -> grid of 3 node tiles
    key = jax.random.PRNGKey(0)
    pkey, nkey = jax.random.split(key)
    params = init_masker_params(pkey, n_heads, n_nodes)   # (2, H, N)

    mask, mask_logits_1 = masker_forward(params, nkey)
    jax.block_until_ready((mask, mask_logits_1))

    # Sanity: shapes, binary mask, logit1 == log_softmax(param)[..., 1].
    assert mask.shape == (n_heads, n_nodes)
    assert mask_logits_1.shape == (n_heads, n_nodes)
    assert bool(jnp.all((mask == 0.0) | (mask == 1.0)))
    ref_ml1 = jax.nn.log_softmax(jnp.stack([params[0], params[1]], -1), -1)[..., 1]
    assert bool(jnp.allclose(mask_logits_1, ref_ml1, atol=1e-5))
    assert bool(jnp.all(mask_logits_1 <= 0.0))
    frac = float(jnp.mean(mask))
    assert 0.2 < frac < 0.8              # logits ~ 0 -> selection prob ~ 0.5

    print("KERNEL_OK")
</pallas_src>

<mosaic_0001>
module attributes {stable_mosaic.version = 11 : i64} {
  func.func @_masker_kernel(%arg0: i32, %arg1: memref<2x8x128xf32, #tpu.memory_space<vmem>>, %arg2: memref<8x128xf32, #tpu.memory_space<vmem>>, %arg3: memref<8x128xf32, #tpu.memory_space<vmem>>, %arg4: memref<8x128xf32, #tpu.memory_space<vmem>>) attributes {dimension_semantics = [#tpu.dimension_semantics<parallel>], iteration_bounds = array<i64: 3>, scalar_prefetch = 0 : i64, scratch_operands = 0 : i64, tpu.core_type = #tpu.core_type<tc>, window_params = [{transform_indices = @transform_0, window_bounds = array<i64: 2, 8, 128>}, {transform_indices = @transform_1, window_bounds = array<i64: 8, 128>}, {transform_indices = @transform_2, window_bounds = array<i64: 8, 128>}, {transform_indices = @transform_3, window_bounds = array<i64: 8, 128>}]} {
    %c0 = arith.constant 0 : index
    %c0_0 = arith.constant 0 : index
    %c0_1 = arith.constant 0 : index
    %0 = vector.load %arg1[%c0, %c0_0, %c0_1] : memref<2x8x128xf32, #tpu.memory_space<vmem>>, vector<1x8x128xf32>
    %1 = vector.shape_cast %0 : vector<1x8x128xf32> to vector<8x128xf32>
    %c1 = arith.constant 1 : index
    %c0_2 = arith.constant 0 : index
    %c0_3 = arith.constant 0 : index
    %2 = vector.load %arg1[%c1, %c0_2, %c0_3] : memref<2x8x128xf32, #tpu.memory_space<vmem>>, vector<1x8x128xf32>
    %3 = vector.shape_cast %2 : vector<1x8x128xf32> to vector<8x128xf32>
    %4 = arith.subf %1, %3 : vector<8x128xf32>
    %cst = arith.constant 0.000000e+00 : f32
    %5 = vector.broadcast %cst : f32 to vector<8x128xf32>
    %6 = arith.maximumf %4, %5 : vector<8x128xf32>
    %7 = math.absf %4 : vector<8x128xf32>
    %cst_4 = arith.constant 0.000000e+00 : f32
    %8 = vector.broadcast %cst_4 : f32 to vector<8x128xf32>
    %9 = arith.subf %8, %7 : vector<8x128xf32>
    %10 = math.exp %9 : vector<8x128xf32>
    %11 = math.log1p %10 : vector<8x128xf32>
    %12 = arith.addf %6, %11 : vector<8x128xf32>
    %cst_5 = arith.constant 0.000000e+00 : f32
    %13 = vector.broadcast %cst_5 : f32 to vector<8x128xf32>
    %14 = arith.subf %13, %12 : vector<8x128xf32>
    %c0_6 = arith.constant 0 : index
    %c0_7 = arith.constant 0 : index
    %15 = vector.load %arg4[%c0_6, %c0_7] : memref<8x128xf32, #tpu.memory_space<vmem>>, vector<8x128xf32>
    tpu.vector_store %arg4[%c0_6, %c0_7], %14 {strides = array<i32>} : memref<8x128xf32, #tpu.memory_space<vmem>>, vector<8x128xf32>,
    %c0_8 = arith.constant 0 : index
    %c0_9 = arith.constant 0 : index
    %16 = vector.load %arg2[%c0_8, %c0_9] : memref<8x128xf32, #tpu.memory_space<vmem>>, vector<8x128xf32>
    %cst_10 = arith.constant 1.000000e-07 : f32
    %cst_11 = arith.constant 0.99999988 : f32
    %17 = vector.broadcast %cst_10 : f32 to vector<8x128xf32>
    %18 = arith.maximumf %17, %16 : vector<8x128xf32>
    %19 = vector.broadcast %cst_11 : f32 to vector<8x128xf32>
    %20 = arith.minimumf %19, %18 : vector<8x128xf32>
    %21 = math.log %20 : vector<8x128xf32>
    %cst_12 = arith.constant 0.000000e+00 : f32
    %22 = vector.broadcast %cst_12 : f32 to vector<8x128xf32>
    %23 = arith.subf %22, %20 : vector<8x128xf32>
    %24 = math.log1p %23 : vector<8x128xf32>
    %25 = arith.subf %21, %24 : vector<8x128xf32>
    %26 = arith.subf %3, %1 : vector<8x128xf32>
    %27 = arith.addf %26, %25 : vector<8x128xf32>
    %cst_13 = arith.constant 0.000000e+00 : f32
    %28 = vector.broadcast %cst_13 : f32 to vector<8x128xf32>
    %29 = arith.cmpf ogt, %27, %28 : vector<8x128xf32>
    %30 = arith.extui %29 : vector<8x128xi1> to vector<8x128xi32>
    %31 = arith.sitofp %30 : vector<8x128xi32> to vector<8x128xf32>
    %c0_14 = arith.constant 0 : index
    %c0_15 = arith.constant 0 : index
    %32 = vector.load %arg3[%c0_14, %c0_15] : memref<8x128xf32, #tpu.memory_space<vmem>>, vector<8x128xf32>
    tpu.vector_store %arg3[%c0_14, %c0_15], %31 {strides = array<i32>} : memref<8x128xf32, #tpu.memory_space<vmem>>, vector<8x128xf32>,
    return
  }
  func.func @transform_0(%arg0: i32) -> (i32, i32, i32) {
    %c0_i32 = arith.constant 0 : i32
    %c0_i32_0 = arith.constant 0 : i32
    %c0_i32_1 = arith.constant 0 : i32
    return %c0_i32, %c0_i32_0, %arg0 : i32, i32, i32
  }
  func.func @transform_1(%arg0: i32) -> (i32, i32) {
    %c0_i32 = arith.constant 0 : i32
    %c0_i32_0 = arith.constant 0 : i32
    return %c0_i32, %arg0 : i32, i32
  }
  func.func @transform_2(%arg0: i32) -> (i32, i32) {
    %c0_i32 = arith.constant 0 : i32
    %c0_i32_0 = arith.constant 0 : i32
    return %c0_i32, %arg0 : i32, i32
  }
  func.func @transform_3(%arg0: i32) -> (i32, i32) {
    %c0_i32 = arith.constant 0 : i32
    %c0_i32_0 = arith.constant 0 : i32
    return %c0_i32, %arg0 : i32, i32
  }
}

</mosaic_0001>

<bundles_post_ra>
// kernel: tpu_custom_call.1
= control target key start
LH: loop header
LB: loop body
LE: loop exit
PB: predicated region body
PF: predicated region fallthrough
CT: control target
= control target key end

     0   :  { %9 = vsyncpa [#allocation3], 0  ;;  %s963_s0 = inlined_call_operand.hbm [shape: f32[2,8,384], index: 0, kind: input, shape index: {}]   ;;  %s964_s1 = inlined_call_operand.hbm [shape: f32[8,384], index: 1, kind: input, shape index: {}]   ;;  %s965_s2 = inlined_call_operand.hbm [shape: f32[8,384], index: 2, kind: output, shape index: {0}]   ;;  %s966_s3 = inlined_call_operand.hbm [shape: f32[8,384], index: 3, kind: output, shape index: {1}]  }
   0x1   :  { %11 = vsyncpa [#allocation3 + $0x1], 0 }
   0x2   :  { %12 = vsyncpa [#allocation6], 0 }
   0x3   :  { %14 = vsyncpa [#allocation6 + $0x1], 0 }
   0x4   :  { %15 = vsyncpa [#allocation4], 0 }
   0x5   :  { %17 = vsyncpa [#allocation4 + $0x1], 0 }
   0x6   :  { %18 = vsyncpa [#allocation9], 0 }
   0x7   :  { %20 = vsyncpa [#allocation9 + $0x1], 0  ;;  %s716_s12 = smov 0   ;;  %s718_s13 = smov 0  }
   0x8   :  { %s720_s14 = smov 0   ;;  %s722_s15 = smov 0  }
   0x9 LB: > { %s737_s16 = sadd.s32 4294967295, %s686_s15   ;;  %s436_s17 = sadd.s32 4294967294, %s686_s15   ;;  %s686_s15 = sphi %s722_s15, %s983_s15   ;;  %s682_s14 = sphi %s720_s14, %s982_s14   ;;  %s678_s13 = sphi %s718_s13, %s981_s13   ;;  %s674_s12 = sphi %s716_s12, %s980_s12  }
   0xa   : > { %s741_s18 = sadd.s32 1, %s686_s15   ;;  %s33_s19 = sadd.s32 1, %s682_s14 }
   0xb   : > { %s30_s20 = ssub.s32 %s686_s15, %s741_s18  ;;  %p40_p0 = scmp.ne.s32.totalorder %s682_s14, %s678_s13 }
   0xc   : > { %p31_p1 = scmp.eq.s32.totalorder %s30_s20, 0  ;;  %p41_p2 = scmp.eq.s32.totalorder %s686_s15, 0 }
   0xd   : > { %p46_p3 = scmp.ne.s32.totalorder %s678_s13, %s674_s12  ;;  %p47_p4 = scmp.eq.s32.totalorder %s737_s16, 0 }
   0xe   : > { %s753_s21 = scalar_select %p31_p1, %s682_s14, %s33_s19  }
   0xf   : > { %p755_p5 = por %p41_p2, %p40_p0  ;;  %p759_p6 = por %p47_p4, %p46_p3 }
  0x10   : > { %p96_p7 = scmp.eq.s32.totalorder %s737_s16, 2  ;;  %p102_p8 = scmp.eq.s32.totalorder %s436_s17, 2 }
  0x11   : > { %s970_s23 = scalar_select %p759_p6, 1, 0 }
  0x12   : > { %p478_p9 = scmp.lt.s32.totalorder %s686_s15, 3  ;;  %p765_p10 = por %p96_p7, %p40_p0 }
  0x13   : > { %p769_p11 = por %p102_p8, %p46_p3  ;;  %s774_s26 = sand.u32 1, %s682_s14  }
  0x14   : > { %s971_s24 = scalar_select %p765_p10, 1, 0 }
  0x15   : > { %s972_s25 = scalar_select %p769_p11, 1, 0 }
  0x16   : > { %s440_s27 = sshll.u32 %s686_s15, 7  ;;  %s439_s28 = sshll.u32 %s774_s26, 4 }
  0x17   : > { %s783_s4 = scalar_lea.hbm %s963_s0, %s440_s27  ;;  %s152_s5 = scalar_lea.vmem [#allocation2], %s439_s28 }
  0x18   : > { %s158_s6 = sshll.u32 %s152_s5, 4  ;;  %p787_p12 = pnand %p478_p9, %p755_p5  ;;  %s791_s6 = int_to_ptr.vmem [resolvable:$true] %s158_s6 }
  0x19   : > { %s149_s8 = scalar_lea.sflag [#allocation3], %s774_s26  ;;  %s524_s9 = scalar_lea.hbm %s783_s4, 256 }
  0x1a   : > { %p525_p0 = scmp.ne.s32.totalorder %s783_s4, %s524_s9  ;;  %p526_p1 = pneg %p787_p12 }
  0x1b   : > { %s529_s17 = scalar_lea.hbm %s963_s0, 768  ;;  %p530_p4 = scmp.lt.u32.totalorder %s783_s4, %s963_s0 }
  0x1c   : > { %p527_p2 = pnand %p526_p1, %p525_p0  ;;  %p531_p5 = scmp.lt.u32.totalorder %s529_s17, %s524_s9 }
  0x1d   : > { %p533_p8 = scmp.lt.u32.totalorder %s524_s9, %s783_s4 }
  0x1e   : > { %p528_p3 = pneg %p527_p2  ;;  %p532_p7 = por %p531_p5, %p530_p4 }
  0x20   : > { %p534_p9 = por %p533_p8, %p532_p7 }
  0x22   : > { %p535_p13 = pnand %p534_p9, %p528_p3 }
  0x24   : > { %538 = shalt.err (!%p535_p13)
}
  0x25   : > { %s539_s22 = scalar_lea.vmem %s791_s6, 256  ;;  %s688_s28 = smov [#allocation2]  }
  0x26   : > { %p540_p0 = scmp.ne.s32.totalorder %s791_s6, %s539_s22  ;;  %s544_s29 = sshll.u32 %s688_s28, 4  ;;  %s545_s29 = int_to_ptr.vmem [resolvable:$false] %s544_s29 }
  0x27   : > { %s546_s30 = scalar_lea.vmem %s545_s29, 512  ;;  %p547_p10 = scmp.lt.s32.totalorder %s791_s6, %s545_s29 }
  0x28   : > { %p542_p2 = pnand %p540_p0, %p526_p1  ;;  %p548_p4 = scmp.lt.s32.totalorder %s546_s30, %s539_s22 }
  0x2a   : > { %p543_p11 = pneg %p542_p2  ;;  %p549_p5 = por %p548_p4, %p547_p10 }
  0x2c   : > { %p550_p7 = pnand %p549_p5, %p543_p11 }
  0x2e   : > { %553 = shalt.err (!%p550_p7)
}
  0x2f   : > { %s689_s5 = smov 384   ;;  %s690_s9 = smov 128  }
  0x30   : > { %s691_s10 = smov 8   ;;  %p184_p13 = scmp.lt.s32.totalorder %s686_s15, 4 }
  0x31   : > { %467 = dma.hbm_to_vmem [thread:$0]  (!%p787_p12), %s783_s4, 256, %s791_s6, %s149_s8, %s689_s5, %s690_s9, %s691_s10  }
  0x32   : > { %s441_s11 = sshll.u32 %s774_s26, 3  ;;  %s829_s20 = scalar_lea.hbm %s964_s1, %s440_s27 }
  0x33   : > { %p974_p10 = scmp.ge.s32.totalorder %s686_s15, 1  ;;  %s172_s28 = scalar_lea.vmem [#allocation5], %s441_s11 }
  0x34   : > { %s179_s29 = sshll.u32 %s172_s28, 4  ;;  %s169_s4 = scalar_lea.sflag [#allocation6], %s774_s26  ;;  %s180_s29 = int_to_ptr.vmem [resolvable:$true] %s179_s29 }
  0x35   : > { %p833_p11 = pnand %p974_p10, %p184_p13  ;;  %s554_s6 = scalar_lea.hbm %s829_s20, 128 }
  0x36   : > { %p555_p3 = scmp.ne.s32.totalorder %s829_s20, %s554_s6  ;;  %s559_s30 = scalar_lea.hbm %s964_s1, 384 }
  0x37   : > { %s975_s22 = scalar_select %p833_p11, 1, 0 }
  0x38   : > { %p557_p8 = pnand %p555_p3, %p526_p1  ;;  %p560_p0 = scmp.lt.u32.totalorder %s829_s20, %s964_s1 }
  0x39   : > { %p561_p2 = scmp.lt.u32.totalorder %s559_s30, %s554_s6  ;;  %p563_p5 = scmp.lt.u32.totalorder %s554_s6, %s829_s20 }
  0x3a   : > { %p558_p9 = pneg %p557_p8 }
  0x3b   : > { %p562_p4 = por %p561_p2, %p560_p0 }
  0x3d   : > { %p564_p7 = por %p563_p5, %p562_p4 }
  0x3f   : > { %p565_p13 = pnand %p564_p7, %p558_p9 }
  0x41   : > { %568 = shalt.err (!%p565_p13)
}
  0x42   : > { %s569_s26 = scalar_lea.vmem %s180_s29, 128  ;;  %s692_s10 = smov [#allocation5]  }
  0x43   : > { %p570_p10 = scmp.ne.s32.totalorder %s180_s29, %s569_s26  ;;  %s574_s11 = sshll.u32 %s692_s10, 4  ;;  %s575_s11 = int_to_ptr.vmem [resolvable:$false] %s574_s11 }
  0x44   : > { %s576_s17 = scalar_lea.vmem %s575_s11, 256  ;;  %p577_p6 = scmp.lt.s32.totalorder %s180_s29, %s575_s11 }
  0x45   : > { %p572_p3 = pnand %p570_p10, %p526_p1  ;;  %p578_p11 = scmp.lt.s32.totalorder %s576_s17, %s569_s26 }
  0x47   : > { %p573_p8 = pneg %p572_p3  ;;  %p579_p0 = por %p578_p11, %p577_p6 }
  0x49   : > { %p580_p2 = pnand %p579_p0, %p573_p8 }
  0x4b   : > { %583 = shalt.err (!%p580_p2)
}
  0x4c   : > { %470 = dma.hbm_to_vmem [thread:$0]  (!%p787_p12), %s829_s20, 128, %s180_s29, %s169_s4  }
  0x4d   : > { %p976_p9 = scmp.ne.s32.totalorder %s975_s22, 0 }
  0x4e   : > { %s860_s19 = sand.u32 (!%p976_p9), 1, %s678_s13   ;;  %p977_p1 = scmp.ne.s32.totalorder (!%p976_p9), %s970_s23, 0 }
  0x4f   : > { %188 = sbr.rel (%p976_p9) target bundleno = 158 (0x9e), region = 28  ;;  %s444_s28 = sshll.u32 (!%p976_p9), %s860_s19, 4 }
  0x50   : > { %s191_s6 = scalar_lea.sflag (!%p976_p9), [#allocation3], %s860_s19  ;;  %s194_s27 = scalar_lea.vmem (!%p976_p9), [#allocation2], %s444_s28 }
  0x56   : > { %657 = dma.done.wait (%p977_p1), %s191_s6, 256  }
  0x57   : > { %659 = vsyncadd (%p977_p1), %s191_s6, 4294967040  ;;  %s869_s7 = sshll.u32 %s860_s19, 3  ;;  %s200_s20 = scalar_lea.sflag [#allocation6], %s860_s19 }
  0x58   : > { %s203_s22 = scalar_lea.vmem [#allocation5], %s869_s7 }
  0x59   : > { %661 = dma.done.wait (%p977_p1), %s200_s20, 128  }
  0x5a   : > { %663 = vsyncadd (%p977_p1), %s200_s20, 4294967168  ;;  %v236_v0 = vld [vmem:[%s194_s27] sm:$0xff]  ;;  %v448_v1 = vld [vmem:[%s194_s27 + $0x8] sm:$0xff]  ;;  %s228_s23 = scalar_lea.vmem [#allocation7], %s869_s7  ;;  %s452_s4 = sshll.u32 %s737_s16, 7  ;;  %v693_v28 = vmov 0.0  }
  0x5b   : > { %v257_v2 = vld [vmem:[%s203_s22] sm:$0xff]  ;;  %v877_v3 = vsub.f32 %v236_v0, %v448_v1  ;;  %v273_v21 = vsub.f32 %v448_v1, %v236_v0  ;;  %s298_s29 = sshll.u32 %s228_s23, 4  ;;  %s889_s5 = scalar_lea.hbm %s965_s2, %s452_s4  ;;  %s882_s29 = int_to_ptr.vmem [resolvable:$true] %s298_s29 }
  0x5c   : > { %v258_v4 = vmax.f32 %v257_v2, 1e-07  ;;  %s280_s9 = scalar_lea.sflag [#allocation4], %s860_s19  ;;  %s584_s26 = scalar_lea.vmem %s882_s29, 128 }
  0x5d   : > { %v241_v5 = vand.u32 2147483647, %v877_v3  ;;  %p585_p6 = scmp.ne.s32.totalorder %s882_s29, %s584_s26  ;;  %p978_p12 = scmp.ne.s32.totalorder %s971_s24, 0 }
  0x5e   : > { %v259_v6 = vmin.f32 %v258_v4, 0.9999999  ;;  %s694_s10 = smov [#allocation7]  }
  0x5f   : > { %v242_v7 = vsub.f32 0.0, %v241_v5  ;;  %p586_p11 = pnand %p585_p6, %p978_p12  ;;  %s588_s11 = sshll.u32 %s694_s10, 4  ;;  %s589_s11 = int_to_ptr.vmem [resolvable:$false] %s588_s11 }
  0x60   : > { %v262_v8 = vsub.f32 0.0, %v259_v6  ;;  %516 = vlog2.f32 %v259_v6  ;;  %s590_s17 = scalar_lea.vmem %s589_s11, 256  ;;  %p591_p5 = scmp.lt.s32.totalorder %s882_s29, %s589_s11 }
  0x61   : > { %v243_v9 = vmul.f32 1.442695, %v242_v7  ;;  %p587_p4 = pneg %p586_p11  ;;  %p592_p7 = scmp.lt.s32.totalorder %s590_s17, %s584_s26 }
  0x62   : > { %v263_v10 = vadd.f32 1.0, %v262_v8  ;;  %v266_v11 = vmul.f32 -0.5, %v262_v8  ;;  %v269_v13 = vand.u32 2147483647, %v262_v8 }
  0x63   : > { %518 = vpow2.f32 %v243_v9  ;;  %p593_p13 = por %p592_p7, %p591_p5 }
  0x64   : > { %520 = vlog2.f32 %v263_v10  ;;  %v267_v12 = vadd.f32 1.0, %v266_v11  ;;  %vm270_vm0 = vcmp.lt.f32.partialorder %v269_v13, 0.0004427343 }
  0x65   : > { %p594_p10 = pnand %p593_p13, %p587_p4 }
  0x66   : > { %v268_v16 = vmul.f32 %v267_v12, %v262_v8 }
  0x6a   : > { %v517_v14 = vpop.eup %516 }
  0x6b   : > { %v261_v19 = vmul.f32 0.6931472, %v517_v14 }
  0x6d   : > { %v519_v15 = vpop.eup %518 }
  0x6e   : > { %v521_v17 = vpop.eup %520  ;;  %v245_v18 = vadd.f32 1.0, %v519_v15  ;;  %v248_v22 = vmul.f32 -0.5, %v519_v15  ;;  %v251_v27 = vand.u32 2147483647, %v519_v15 }
  0x6f   : > { %v265_v20 = vmul.f32 0.6931472, %v521_v17 }
  0x70   : > { %522 = vlog2.f32 %v245_v18  ;;  %v249_v26 = vadd.f32 1.0, %v248_v22 }
  0x71   : > { %v271_v23 = vsel %vm270_vm0, %v268_v16, %v265_v20 }
  0x72   : > { %v272_v24 = vsub.f32 %v261_v19, %v271_v23  ;;  %v250_v30 = vmul.f32 %v519_v15, %v249_v26 }
  0x74   : > { %v274_v25 = vadd.f32 %v273_v21, %v272_v24 }
  0x76   : > { %vm275_vm1 = vcmp.gt.f32.partialorder %v274_v25, 0.0 }
  0x77   : > { %v449_v29 = vsel %vm275_vm1, 1.0, %v693_v28 }
  0x78   : > { %278 = vst [vmem:[%s228_s23] sm:$0xff] %v449_v29 }
  0x79   : > { %597 = shalt.err (!%p594_p10)
}
  0x7a   : > { %s598_s28 = scalar_lea.hbm %s889_s5, 128  ;;  %s602_s20 = scalar_lea.hbm %s965_s2, 384 }
  0x7b   : > { %p599_p3 = scmp.ne.s32.totalorder %s889_s5, %s598_s28  ;;  %p603_p2 = scmp.lt.u32.totalorder %s889_s5, %s965_s2 }
  0x7c   : > { %p604_p9 = scmp.lt.u32.totalorder %s602_s20, %s598_s28  ;;  %p606_p6 = scmp.lt.u32.totalorder %s598_s28, %s889_s5 }
  0x7d   : > { %p600_p8 = pnand %p599_p3, %p978_p12 }
  0x7e   : > { %p605_p1 = por %p604_p9, %p603_p2 }
  0x7f   : > { %p601_p0 = pneg %p600_p8 }
  0x80   : > { %p607_p11 = por %p606_p6, %p605_p1 }
  0x82   : > { %p608_p4 = pnand %p607_p11, %p601_p0 }
  0x84   : > { %611 = shalt.err (!%p608_p4)
}
  0x85   : > { %460 = dma.vmem_to_hbm [thread:$0]  (%p978_p12), %s882_s29, 128, %s889_s5, %s280_s9   ;;  %v523_v31 = vpop.eup %522  ;;  %v240_v32 = vmax.f32 %v877_v3, 0.0  ;;  %vm252_vm2 = vcmp.lt.f32.partialorder %v251_v27, 0.0004427343 }
  0x86   : > { %v247_v33 = vmul.f32 0.6931472, %v523_v31  ;;  %s235_s8 = scalar_lea.vmem [#allocation8], %s869_s7  ;;  %s922_s29 = scalar_lea.hbm %s966_s3, %s452_s4 }
  0x87   : > { %s311_s30 = sshll.u32 %s235_s8, 4  ;;  %s285_s5 = scalar_lea.sflag [#allocation9], %s860_s19  ;;  %s915_s30 = int_to_ptr.vmem [resolvable:$true] %s311_s30 }
  0x88   : > { %v253_v34 = vsel %vm252_vm2, %v250_v30, %v247_v33  ;;  %s612_s9 = scalar_lea.vmem %s915_s30, 128  ;;  %s695_s7 = smov [#allocation8]  }
  0x89   : > { %v254_v35 = vadd.f32 %v253_v34, %v240_v32  ;;  %p613_p5 = scmp.ne.s32.totalorder %s915_s30, %s612_s9  ;;  %s616_s11 = sshll.u32 %s695_s7, 4  ;;  %s617_s11 = int_to_ptr.vmem [resolvable:$false] %s616_s11 }
  0x8a   : > { %s618_s17 = scalar_lea.vmem %s617_s11, 256  ;;  %p619_p10 = scmp.lt.s32.totalorder %s915_s30, %s617_s11 }
  0x8b   : > { %v255_v36 = vsub.f32 0.0, %v254_v35  ;;  %p614_p7 = pnand %p613_p5, %p978_p12  ;;  %p620_p3 = scmp.lt.s32.totalorder %s618_s17, %s612_s9 }
  0x8d   : > { %256 = vst [vmem:[%s235_s8] sm:$0xff] %v255_v36  ;;  %p615_p13 = pneg %p614_p7  ;;  %p621_p8 = por %p620_p3, %p619_p10 }
  0x8f   : > { %p622_p0 = pnand %p621_p8, %p615_p13 }
  0x91   : > { %625 = shalt.err (!%p622_p0)
}
  0x92   : > { %s626_s16 = scalar_lea.hbm %s922_s29, 128  ;;  %s630_s28 = scalar_lea.hbm %s966_s3, 384 }
  0x93   : > { %p627_p2 = scmp.ne.s32.totalorder %s922_s29, %s626_s16  ;;  %p631_p6 = scmp.lt.u32.totalorder %s922_s29, %s966_s3 }
  0x94   : > { %p632_p11 = scmp.lt.u32.totalorder %s630_s28, %s626_s16  ;;  %p634_p5 = scmp.lt.u32.totalorder %s626_s16, %s922_s29 }
  0x95   : > { %p628_p9 = pnand %p627_p2, %p978_p12 }
  0x96   : > { %p633_p4 = por %p632_p11, %p631_p6 }
  0x97   : > { %p629_p1 = pneg %p628_p9 }
  0x98   : > { %p635_p7 = por %p634_p5, %p633_p4 }
  0x9a   : > { %p636_p13 = pnand %p635_p7, %p629_p1 }
  0x9c   : > { %639 = shalt.err (!%p636_p13)
}
  0x9d   : > { %461 = dma.vmem_to_hbm [thread:$0]  (%p978_p12), %s915_s30, 128, %s922_s29, %s285_s5  }
  0x9e PF: > { %p479_p10 = scmp.ge.s32.totalorder %s686_s15, 2  ;;  %s323_s20 = sand.u32 1, %s674_s12  }
  0x9f   : > { %p979_p3 = scmp.ne.s32.totalorder %s972_s25, 0  ;;  %s324_s22 = scalar_lea.sflag [#allocation4], %s323_s20 }
  0xa1   : > { %p472_p8 = pnand %p479_p10, %p979_p3 }
  0xa3   : > { %665 = dma.done.wait (!%p472_p8), %s324_s22, 128  }
  0xa4   : > { %667 = vsyncadd (!%p472_p8), %s324_s22, 4294967168  ;;  %s333_s23 = scalar_lea.sflag [#allocation9], %s323_s20 }
  0xa5   : > { %669 = dma.done.wait (!%p472_p8), %s333_s23, 128  }
  0xa6   : > { %671 = vsyncadd (!%p472_p8), %s333_s23, 4294967168  ;;  %p23_p12 = scmp.ge.s32.totalorder %s741_s18, 5   ;;  %s980_s12 = smov %s678_s13 }
  0xa7   : > { %s981_s13 = smov %s682_s14  ;;  %s982_s14 = smov %s753_s21 }
  0xa8   : > { %s983_s15 = smov %s741_s18  ;;  %25 = sbr.rel (!%p23_p12) target bundleno = 9 (0x9), region = 104 }
  0xaf   :  { %338 = vsyncpa [#allocation3], 1 }
  0xb0   :  { %340 = vsyncpa [#allocation3 + $0x1], 1 }
  0xb1   :  { %341 = vsyncpa [#allocation6], 1 }
  0xb2   :  { %343 = vsyncpa [#allocation6 + $0x1], 1 }
  0xb3   :  { %344 = vsyncpa [#allocation4], 1 }
  0xb4   :  { %346 = vsyncpa [#allocation4 + $0x1], 1 }
  0xb5   :  { %347 = vsyncpa [#allocation9], 1 }
  0xb6   :  { %349 = vsyncpa [#allocation9 + $0x1], 1 }

</bundles_post_ra>
